<compile_context>
chip_gen: v7x
topology: tpu7x:2x2x1
jax: 0.10.0
libtpu: 0.0.40
codegen_flags: <defaults>
</compile_context>

<pallas_src>
import functools
import math

import jax
import jax.numpy as jnp
from jax.experimental import pallas as pl
from jax.experimental.pallas import tpu as pltpu

_LANE = 128


def _round_up(x, m):
    return ((x + m - 1) // m) * m


def _vmem_limit_bytes():
    """Generation-aware scoped-VMEM limit (leave ~25% headroom)."""
    try:
        cap = pltpu.get_tpu_info().vmem_capacity_bytes
    except Exception:
        cap = 64 * 1024 * 1024  # conservative fallback: v7x per-TensorCore
    return min(int(cap * 3 // 4), 96 * 1024 * 1024)


def _select_config(n, d):
    """Pick (tm, tn, tk, n_pad, d_pad) from the problem shape."""
    d_128 = _round_up(d, _LANE)
    if d_128 <= 1024:
        tk, d_pad = d_128, d_128            # single K block -> no k grid axis
    else:
        tk = 512
        d_pad = _round_up(d, tk)

    n_128 = _round_up(n, _LANE)
    if n_128 <= 2048:
        # Small-graph path: one lane-dense column of output tiles.  Minimal
        # padding; zj (= z.T) block index is constant across i, so every
        # operand byte is DMA'd from HBM exactly once.
        n_pad = n_128
        tn = n_pad
        tm = 256 if (n_pad % 256 == 0) else _LANE
        tm = min(tm, n_pad)
    else:
        # Large-graph path: big square tiles cut operand re-fetch ~4x vs
        # 128x128 and give wide unmasked vector stores.
        tm = tn = 512
        n_pad = _round_up(n, 512)
    return tm, tn, tk, n_pad, d_pad


def _ipd_kernel_single_k(zi_ref, zjt_ref, out_ref):
    """One (tm, tn) output tile; the full feature dim fits in one block."""
    out_ref[...] = jnp.dot(
        zi_ref[...], zjt_ref[...], preferred_element_type=jnp.float32
    ).astype(out_ref.dtype)


def _ipd_kernel_multi_k(zi_ref, zjt_ref, out_ref, acc_ref):
    """(i, j, k) grid variant with an f32 accumulator; k (reduction) is last."""

    @pl.when(pl.program_id(2) == 0)
    def _init():
        acc_ref[...] = jnp.zeros_like(acc_ref)

    acc_ref[...] += jnp.dot(
        zi_ref[...], zjt_ref[...], preferred_element_type=jnp.float32
    )

    @pl.when(pl.program_id(2) == pl.num_programs(2) - 1)
    def _finalize():
        out_ref[...] = acc_ref[...].astype(out_ref.dtype)


@functools.partial(
    jax.jit, static_argnames=("out_dtype", "mxu_dtype", "unpad")
)
def inner_product_dec(z, *, out_dtype=jnp.float32, mxu_dtype=jnp.bfloat16,
                      unpad=True):
    """Eval-mode InnerProductDec: returns z @ z.T.

    z: (N, D) float array.  Pads N/D up to tile multiples with zeros (zero
    rows/cols contribute nothing), casts MXU operands to `mxu_dtype` once,
    pre-transposes z once so the MXU sees canonical (M,K)x(K,N) blocks, and
    runs a pipelined tiled matmul.  Set unpad=False to skip the post-kernel
    slice (avoids an extra N^2 HBM pass; caller then slices [:N, :N] itself).
    """
    n, d = z.shape
    tm, tn, tk, n_pad, d_pad = _select_config(n, d)
    vmem_limit = _vmem_limit_bytes()

    zp = z
    if (n_pad, d_pad) != (n, d):
        zp = jnp.pad(z, ((0, n_pad - n), (0, d_pad - d)))
    zp = zp.astype(mxu_dtype)
    zt = zp.T  # (d_pad, n_pad): one cheap wrapper transpose, reused every tile

    grid_i = n_pad // tm
    grid_j = n_pad // tn
    grid_k = d_pad // tk

    if grid_k == 1:
        kernel = _ipd_kernel_single_k
        grid = (grid_i, grid_j)
        in_specs = [
            pl.BlockSpec((tm, tk), lambda i, j: (i, 0)),   # row tile of z
            pl.BlockSpec((tk, tn), lambda i, j: (0, j)),   # col tile of z.T
        ]
        out_specs = pl.BlockSpec((tm, tn), lambda i, j: (i, j))
        scratch = []
        dims = ("parallel", "parallel")
    else:
        kernel = _ipd_kernel_multi_k
        grid = (grid_i, grid_j, grid_k)
        in_specs = [
            pl.BlockSpec((tm, tk), lambda i, j, k: (i, k)),
            pl.BlockSpec((tk, tn), lambda i, j, k: (k, j)),
        ]
        out_specs = pl.BlockSpec((tm, tn), lambda i, j, k: (i, j))
        scratch = [pltpu.VMEM((tm, tn), jnp.float32)]
        dims = ("parallel", "parallel", "arbitrary")

    out = pl.pallas_call(
        kernel,
        out_shape=jax.ShapeDtypeStruct((n_pad, n_pad), out_dtype),
        grid_spec=pltpu.PrefetchScalarGridSpec(
            num_scalar_prefetch=0,
            grid=grid,
            in_specs=in_specs,
            out_specs=out_specs,
            scratch_shapes=scratch,
        ),
        compiler_params=pltpu.CompilerParams(
            dimension_semantics=dims,
            vmem_limit_bytes=vmem_limit,
        ),
    )(zp, zt)

    if unpad and n_pad != n:
        out = out[:n, :n]
    return out


if __name__ == "__main__":
    key = jax.random.PRNGKey(0)
    k1, k2 = jax.random.split(key)

    # Test 1: small, non-tile-aligned graph (N=300 nodes, D=192 dims).
    # Exercises the single-K-block fast path with bf16 MXU operands.
    N1, D1 = 300, 192
    z1 = jax.random.normal(k1, (N1, D1), jnp.float32)
    out1 = jax.block_until_ready(inner_product_dec(z1))
    ref1 = z1 @ z1.T
    assert out1.shape == ref1.shape, (out1.shape, ref1.shape)
    tol1 = 0.05 * math.sqrt(D1)  # bf16 operands, f32 accumulation
    err1 = float(jnp.max(jnp.abs(out1 - ref1)))
    assert jnp.allclose(out1, ref1, atol=tol1, rtol=2e-2), err1

    # Test 2: larger feature dim (D=1500 -> padded 1536, 3 K steps).
    # Exercises the (i, j, k) accumulator path and the f32 operand escape hatch.
    N2, D2 = 128, 1500
    z2 = jax.random.normal(k2, (N2, D2), jnp.float32)
    out2 = jax.block_until_ready(
        inner_product_dec(z2, mxu_dtype=jnp.float32))
    ref2 = z2 @ z2.T
    assert out2.shape == ref2.shape, (out2.shape, ref2.shape)
    tol2 = 0.05 * math.sqrt(D2)
    err2 = float(jnp.max(jnp.abs(out2 - ref2)))
    assert jnp.allclose(out2, ref2, atol=tol2, rtol=2e-2), err2

    print("KERNEL_OK")
</pallas_src>

<mosaic_0001>
module attributes {stable_mosaic.version = 11 : i64} {
  func.func @_ipd_kernel_single_k(%arg0: i32, %arg1: i32, %arg2: memref<128x256xbf16, #tpu.memory_space<vmem>>, %arg3: memref<256x384xbf16, #tpu.memory_space<vmem>>, %arg4: memref<128x384xf32, #tpu.memory_space<vmem>>) attributes {dimension_semantics = [#tpu.dimension_semantics<parallel>, #tpu.dimension_semantics<parallel>], iteration_bounds = array<i64: 3, 1>, scalar_prefetch = 0 : i64, scratch_operands = 0 : i64, tpu.core_type = #tpu.core_type<tc>, window_params = [{transform_indices = @transform_0, window_bounds = array<i64: 128, 256>}, {transform_indices = @transform_1, window_bounds = array<i64: 256, 384>}, {transform_indices = @transform_2, window_bounds = array<i64: 128, 384>}]} {
    %c0 = arith.constant 0 : index
    %c0_0 = arith.constant 0 : index
    %0 = vector.load %arg2[%c0, %c0_0] : memref<128x256xbf16, #tpu.memory_space<vmem>>, vector<128x256xbf16>
    %c0_1 = arith.constant 0 : index
    %c0_2 = arith.constant 0 : index
    %1 = vector.load %arg3[%c0_1, %c0_2] : memref<256x384xbf16, #tpu.memory_space<vmem>>, vector<256x384xbf16>
    %cst = arith.constant dense<0.000000e+00> : vector<128x384xf32>
    %2 = tpu.matmul %0, %1, %cst {dimension_numbers = #tpu.dot_dimension_numbers<[1], [0], [0], [1], [0, 0, 1, 1], [], []>} : vector<128x256xbf16>, vector<256x384xbf16>, vector<128x384xf32> -> vector<128x384xf32>
    %c0_3 = arith.constant 0 : index
    %c0_4 = arith.constant 0 : index
    %3 = vector.load %arg4[%c0_3, %c0_4] : memref<128x384xf32, #tpu.memory_space<vmem>>, vector<128x384xf32>
    tpu.vector_store %arg4[%c0_3, %c0_4], %2 {strides = array<i32>} : memref<128x384xf32, #tpu.memory_space<vmem>>, vector<128x384xf32>,
    return
  }
  func.func @transform_0(%arg0: i32, %arg1: i32) -> (i32, i32) {
    %c0_i32 = arith.constant 0 : i32
    %c0_i32_0 = arith.constant 0 : i32
    return %arg0, %c0_i32 : i32, i32
  }
  func.func @transform_1(%arg0: i32, %arg1: i32) -> (i32, i32) {
    %c0_i32 = arith.constant 0 : i32
    %c0_i32_0 = arith.constant 0 : i32
    return %c0_i32, %arg1 : i32, i32
  }
  func.func @transform_2(%arg0: i32, %arg1: i32) -> (i32, i32) {
    %c0_i32 = arith.constant 0 : i32
    return %arg0, %arg1 : i32, i32
  }
}

</mosaic_0001>

<bundles_post_ra>
// kernel: inner_product_dec.1
= control target key start
LH: loop header
LB: loop body
LE: loop exit
PB: predicated region body
PF: predicated region fallthrough
CT: control target
= control target key end

     0   :  { %s1265_s9 = smov 0   ;;  %s1267_s10 = smov 0   ;;  %s1517_s0 = inlined_call_operand.vmem [shape: bf16[384,256], index: 0, kind: input, shape index: {}]   ;;  %s1518_s1 = inlined_call_operand.vmem [shape: bf16[256,384], index: 1, kind: input, shape index: {}]   ;;  %s1519_s2 = inlined_call_operand.vmem [shape: f32[384,384], index: 2, kind: output, shape index: {}]  }
   0x1   :  { %s1269_s11 = smov 0  }
   0x2 LB: > { %s24_s12 = sadd.s32 1, %s1244_s10  ;;  %p976_p0 = scmp.ge.s32.totalorder %s1248_s11, 1  ;;  %s1248_s11 = sphi %s1269_s11, %s12_s11   ;;  %s1244_s10 = sphi %s1267_s10, %s1521_s10   ;;  %s1240_s9 = sphi %s1265_s9, %s1520_s9  }
   0x3   : > { %p26_p1 = scmp.ge.s32.totalorder %s24_s12, 3  ;;  %p139_p2 = scmp.lt.s32.totalorder %s1248_s11, 4 }
   0x5   : > { %s1523_s12 = smov (%p26_p1, %s24_s12), 0  ;;  %p140_p3 = pnand %p976_p0, %p139_p2 }
   0x6   : > { %v1138_v0 = vld [vmem:[%s1518_s1 + $0x4] ss:$12 sps:$4 sm:$0xff] (!%p140_p3)   ;;  %v1140_v1 = vld [vmem:[%s1518_s1] ss:$12 sps:$4 sm:$0xff] (!%p140_p3)   ;;  %v1141_v2 = vld [vmem:[%s1518_s1 + $0x1c] ss:$12 sps:$4 sm:$0xff] (!%p140_p3)  }
   0x7   : > { %143 = sbr.rel (%p140_p3) target bundleno = 343 (0x157), region = 28  ;;  %614 = vmatprep.subr.bf16.mxu0 (!%p140_p3), %v1138_v0  ;;  %v1143_v3 = vld [vmem:[%s1518_s1 + $0x18] ss:$12 sps:$4 sm:$0xff] (!%p140_p3)   ;;  %v1144_v4 = vld [vmem:[%s1518_s1 + $0x34] ss:$12 sps:$4 sm:$0xff] (!%p140_p3)   ;;  %s977_s23 = sshll.u32 (!%p140_p3), %s1240_s9, 4 }
   0x8   : > { %615 = vmatpush1.bf16.msra.mxu0 (!%p140_p3), %v1140_v1  ;;  %v1146_v5 = vld [vmem:[%s1518_s1 + $0x30] ss:$12 sps:$4 sm:$0xff] (!%p140_p3)   ;;  %v1147_v6 = vld [vmem:[%s1518_s1 + $0x4c] ss:$12 sps:$4 sm:$0xff] (!%p140_p3)   ;;  %v1159_v7 = vld [vmem:[%s1518_s1 + $0xc8] ss:$12 sps:$4 sm:$0xff] (!%p140_p3)  }
   0x9   : > { %616 = vmatprep.subr.bf16.mxu0 (!%p140_p3), %v1141_v2  ;;  %v1149_v8 = vld [vmem:[%s1518_s1 + $0x48] ss:$12 sps:$4 sm:$0xff] (!%p140_p3)   ;;  %v1150_v9 = vld [vmem:[%s1518_s1 + $0x64] ss:$12 sps:$4 sm:$0xff] (!%p140_p3)   ;;  %1049 = vmatprep.subr.bf16.mxu1 (!%p140_p3), %v1159_v7  ;;  %v1164_v11 = vld [vmem:[%s1518_s1 + $0xe0] ss:$12 sps:$4 sm:$0xff] (!%p140_p3)  }
   0xa   : > { %v1162_v10 = vld [vmem:[%s1518_s1 + $0x8] ss:$12 sps:$4 sm:$0xff] (!%p140_p3)   ;;  %v1152_v12 = vld [vmem:[%s1518_s1 + $0x60] ss:$12 sps:$4 sm:$0xff] (!%p140_p3)   ;;  %v1169_v15 = vld [vmem:[%s1518_s1 + $0xf8] ss:$12 sps:$4 sm:$0xff] (!%p140_p3)  }
   0xb   : > { %1050 = vmatpush3.bf16.msra.mxu1 (!%p140_p3), %v1162_v10  ;;  %v1153_v13 = vld [vmem:[%s1518_s1 + $0x7c] ss:$12 sps:$4 sm:$0xff] (!%p140_p3)   ;;  %v1167_v14 = vld [vmem:[%s1518_s1 + $0x20] ss:$12 sps:$4 sm:$0xff] (!%p140_p3)   ;;  %v1155_v16 = vld [vmem:[%s1518_s1 + $0x78] ss:$12 sps:$4 sm:$0xff] (!%p140_p3)  }
   0xc   : > { %617 = vmatpush1.bf16.msra.mxu0 (!%p140_p3), %v1143_v3  ;;  %1051 = vmatprep.subr.bf16.mxu1 (!%p140_p3), %v1164_v11  ;;  %v1172_v17 = vld [vmem:[%s1518_s1 + $0x38] ss:$12 sps:$4 sm:$0xff] (!%p140_p3)   ;;  %v1156_v18 = vld [vmem:[%s1518_s1 + $0x94] ss:$12 sps:$4 sm:$0xff] (!%p140_p3)   ;;  %v1174_v19 = vld [vmem:[%s1518_s1 + $0x110] ss:$12 sps:$4 sm:$0xff] (!%p140_p3)  }
   0xd   : > { %618 = vmatprep.subr.bf16.mxu0 (!%p140_p3), %v1144_v4  ;;  %p173_p4 = scmp.lt.s32.totalorder (!%p140_p3), %s977_s23, 47  ;;  %v1158_v20 = vld [vmem:[%s1518_s1 + $0x90] ss:$12 sps:$4 sm:$0xff] (!%p140_p3)   ;;  %v1179_v22 = vld [vmem:[%s1518_s1 + $0x128] ss:$12 sps:$4 sm:$0xff] (!%p140_p3)  }
   0xe   : > { %v1177_v21 = vld [vmem:[%s1518_s1 + $0x50] ss:$12 sps:$4 sm:$0xff]   ;;  %v1160_v23 = vld [vmem:[%s1518_s1 + $0xac] ss:$12 sps:$4 sm:$0xff]   ;;  %v1163_v24 = vld [vmem:[%s1518_s1 + $0xa8] ss:$12 sps:$4 sm:$0xff]  }
   0xf   : > { %1052 = vmatpush3.bf16.msra.mxu1 %v1167_v14  ;;  %s1525_s23 = smov (!%p173_p4, %s977_s23), 47  ;;  %v1182_v25 = vld [vmem:[%s1518_s1 + $0x68] ss:$12 sps:$4 sm:$0xff]   ;;  %v1184_v26 = vld [vmem:[%s1518_s1 + $0x140] ss:$12 sps:$4 sm:$0xff]  }
  0x10   : > { %619 = vmatpush1.bf16.msra.mxu0 %v1146_v5  ;;  %1053 = vmatprep.subr.bf16.mxu1 %v1169_v15  ;;  %v1165_v27 = vld [vmem:[%s1518_s1 + $0xc4] ss:$12 sps:$4 sm:$0xff]   ;;  %v1168_v28 = vld [vmem:[%s1518_s1 + $0xc0] ss:$12 sps:$4 sm:$0xff]   ;;  %s1048_s26 = sshll.u32 %s1525_s23, 3  ;;  %s1113_s18 = smul.u32 24, %s1525_s23 }
  0x11   : > { %620 = vmatprep.subr.bf16.mxu0 %v1147_v6  ;;  %v1187_v29 = vld [vmem:[%s1518_s1 + $0x80] ss:$12 sps:$4 sm:$0xff]   ;;  %v1189_v30 = vld [vmem:[%s1518_s1 + $0x158] ss:$12 sps:$4 sm:$0xff]   ;;  %v1170_v31 = vld [vmem:[%s1518_s1 + $0xdc] ss:$12 sps:$4 sm:$0xff]   ;;  %s1391_s6 = scalar_lea.vmem %s1517_s0, %s1048_s26 }
  0x12   : > { %v1192_v32 = vld [vmem:[%s1518_s1 + $0x98] ss:$12 sps:$4 sm:$0xff]   ;;  %v1194_v34 = vld [vmem:[%s1518_s1 + $0x170] ss:$12 sps:$4 sm:$0xff]   ;;  %v1175_v35 = vld [vmem:[%s1518_s1 + $0xf4] ss:$12 sps:$4 sm:$0xff]   ;;  %s1458_s21 = scalar_lea.vmem %s1519_s2, %s1113_s18 }
  0x13   : > { %1054 = vmatpush3.bf16.msra.mxu1 %v1172_v17  ;;  %v1173_v33 = vld [vmem:[%s1518_s1 + $0xd8] ss:$12 sps:$4 sm:$0xff]   ;;  %v1197_v37 = vld [vmem:[%s1518_s1 + $0xb0] ss:$12 sps:$4 sm:$0xff]   ;;  %v1199_v40 = vld [vmem:[%s1391_s6] ss:$8 sps:$4 sm:$0xff]  }
  0x14   : > { %621 = vmatpush1.bf16.msra.mxu0 %v1149_v8  ;;  %1055 = vmatprep.subr.bf16.mxu1 %v1174_v19  ;;  %v1201_v36 = vld [vmem:[%s1391_s6 + $0x4] ss:$8 sps:$4 sm:$0xff]   ;;  %v1178_v38 = vld [vmem:[%s1518_s1 + $0xf0] ss:$12 sps:$4 sm:$0xff]   ;;  %v1183_v42 = vld [vmem:[%s1518_s1 + $0x108] ss:$12 sps:$4 sm:$0xff]  }
  0x15   : > { %622 = vmatprep.subr.bf16.mxu0 %v1150_v9  ;;  %v1180_v39 = vld [vmem:[%s1518_s1 + $0x10c] ss:$12 sps:$4 sm:$0xff]   ;;  %759 = vmatprep.mubr.bf16.mxu1 %v1201_v36  ;;  %v1205_v41 = vld [vmem:[%s1391_s6 + $0x14] ss:$8 sps:$4 sm:$0xff]   ;;  %v1185_v43 = vld [vmem:[%s1518_s1 + $0x124] ss:$12 sps:$4 sm:$0xff]  }
  0x16   : > { %646 = vmatprep.mubr.bf16.mxu0 %v1201_v36  ;;  %v1188_v44 = vld [vmem:[%s1518_s1 + $0x120] ss:$12 sps:$4 sm:$0xff]   ;;  %v1190_v45 = vld [vmem:[%s1518_s1 + $0x13c] ss:$12 sps:$4 sm:$0xff]   ;;  %v1207_v46 = vld [vmem:[%s1391_s6 + $0x10] ss:$8 sps:$4 sm:$0xff]  }
  0x17   : > { %1056 = vmatpush3.bf16.msra.mxu1 %v1177_v21  ;;  %v1208_v47 = vld [vmem:[%s1391_s6 + $0x24] ss:$8 sps:$4 sm:$0xff]   ;;  %v1195_v49 = vld [vmem:[%s1518_s1 + $0x154] ss:$12 sps:$4 sm:$0xff]   ;;  %v1198_v50 = vld [vmem:[%s1518_s1 + $0x150] ss:$12 sps:$4 sm:$0xff]  }
  0x18   : > { %623 = vmatpush1.bf16.msra.mxu0 %v1152_v12  ;;  %1057 = vmatprep.subr.bf16.mxu1 %v1179_v22  ;;  %v1193_v48 = vld [vmem:[%s1518_s1 + $0x138] ss:$12 sps:$4 sm:$0xff]   ;;  %v1210_v52 = vld [vmem:[%s1391_s6 + $0x20] ss:$8 sps:$4 sm:$0xff]   ;;  %v1211_v53 = vld [vmem:[%s1391_s6 + $0x34] ss:$8 sps:$4 sm:$0xff]  }
  0x19   : > { %624 = vmatprep.subr.bf16.mxu0 %v1153_v13  ;;  %v1202_v51 = vld [vmem:[%s1518_s1 + $0x16c] ss:$12 sps:$4 sm:$0xff]   ;;  %v1204_v54 = vld [vmem:[%s1518_s1 + $0x168] ss:$12 sps:$4 sm:$0xff]  }
  0x1a   : > { %v1213_v55 = vld [vmem:[%s1391_s6 + $0x30] ss:$8 sps:$4 sm:$0xff]   ;;  %v1214_v56 = vld [vmem:[%s1391_s6 + $0x44] ss:$8 sps:$4 sm:$0xff]   ;;  %v1216_v57 = vld [vmem:[%s1391_s6 + $0x40] ss:$8 sps:$4 sm:$0xff]  }
  0x1b   : > { %1058 = vmatpush3.bf16.msra.mxu1 %v1182_v25  ;;  %v1217_v58 = vld [vmem:[%s1391_s6 + $0x54] ss:$8 sps:$4 sm:$0xff]   ;;  %v1219_v59 = vld [vmem:[%s1391_s6 + $0x50] ss:$8 sps:$4 sm:$0xff]   ;;  %v1220_v60 = vld [vmem:[%s1391_s6 + $0x64] ss:$8 sps:$4 sm:$0xff]  }
  0x1c   : > { %625 = vmatpush1.bf16.msra.mxu0 %v1155_v16  ;;  %1059 = vmatprep.subr.bf16.mxu1 %v1184_v26  ;;  %v1222_v61 = vld [vmem:[%s1391_s6 + $0x60] ss:$8 sps:$4 sm:$0xff]   ;;  %v1223_v62 = vld [vmem:[%s1391_s6 + $0x74] ss:$8 sps:$4 sm:$0xff]   ;;  %v1225_v63 = vld [vmem:[%s1391_s6 + $0x70] ss:$8 sps:$4 sm:$0xff]  }
  0x1d   : > { %626 = vmatprep.subr.bf16.mxu0 %v1156_v18 }
  0x1f   : > { %1060 = vmatpush3.bf16.msra.mxu1 %v1187_v29 }
  0x20   : > { %627 = vmatpush1.bf16.msra.mxu0 %v1158_v20  ;;  %1061 = vmatprep.subr.bf16.mxu1 %v1189_v30 }
  0x21   : > { %628 = vmatprep.subr.bf16.mxu0 %v1160_v23 }
  0x23   : > { %1062 = vmatpush3.bf16.msra.mxu1 %v1192_v32 }
  0x24   : > { %629 = vmatpush1.bf16.msra.mxu0 %v1163_v24  ;;  %1063 = vmatprep.subr.bf16.mxu1 %v1194_v34 }
  0x25   : > { %630 = vmatprep.subr.bf16.mxu0 %v1165_v27 }
  0x27   : > { %1064 = vmatpush3.bf16.msra.mxu1 %v1197_v37 }
  0x28   : > { %631 = vmatpush1.bf16.msra.mxu0 %v1168_v28 }
  0x29   : > { %632 = vmatprep.subr.bf16.mxu0 %v1170_v31 }
  0x2a   : > { %760 = vmatmul.mubr.bf16.vlgmr.msra.gmra.mrb[0].mxu1 %v1199_v40 }
  0x2b   : > { %767 = vmatprep.mubr.bf16.mxu1 %v1205_v41 }
  0x2c   : > { %633 = vmatpush1.bf16.msra.mxu0 %v1173_v33 }
  0x2d   : > { %634 = vmatprep.subr.bf16.mxu0 %v1175_v35 }
  0x30   : > { %635 = vmatpush1.bf16.msra.mxu0 %v1178_v38 }
  0x31   : > { %636 = vmatprep.subr.bf16.mxu0 %v1180_v39 }
  0x32   : > { %768 = vmatmul.mubr.bf16.gmra.mrb[4].mxu1 %v1207_v46 }
  0x33   : > { %775 = vmatprep.mubr.bf16.mxu1 %v1208_v47 }
  0x34   : > { %637 = vmatpush1.bf16.msra.mxu0 %v1183_v42 }
  0x35   : > { %638 = vmatprep.subr.bf16.mxu0 %v1185_v43 }
  0x38   : > { %639 = vmatpush1.bf16.msra.mxu0 %v1188_v44 }
  0x39   : > { %640 = vmatprep.subr.bf16.mxu0 %v1190_v45 }
  0x3a   : > { %776 = vmatmul.mubr.bf16.gmra.mrb[8].mxu1 %v1210_v52 }
  0x3b   : > { %783 = vmatprep.mubr.bf16.mxu1 %v1211_v53 }
  0x3c   : > { %641 = vmatpush1.bf16.msra.mxu0 %v1193_v48 }
  0x3d   : > { %642 = vmatprep.subr.bf16.mxu0 %v1195_v49 }
  0x40   : > { %643 = vmatpush1.bf16.msra.mxu0 %v1198_v50 }
  0x41   : > { %644 = vmatprep.subr.bf16.mxu0 %v1202_v51 }
  0x42   : > { %784 = vmatmul.mubr.bf16.gmra.mrb[12].mxu1 %v1213_v55 }
  0x43   : > { %791 = vmatprep.mubr.bf16.mxu1 %v1214_v56 }
  0x44   : > { %645 = vmatpush1.bf16.msra.mxu0 %v1204_v54 }
  0x47   : > { %647 = vmatmul.mubr.bf16.vlgmr.msra.gmra.mrb[0].mxu0 %v1199_v40 }
  0x48   : > { %656 = vmatprep.mubr.bf16.mxu0 %v1205_v41 }
  0x4a   : > { %792 = vmatmul.mubr.bf16.gmra.mrb[16].mxu1 %v1216_v57 }
  0x4b   : > { %799 = vmatprep.mubr.bf16.mxu1 %v1217_v58 }
  0x4f   : > { %657 = vmatmul.mubr.bf16.gmra.mrb[4].mxu0 %v1207_v46 }
  0x50   : > { %666 = vmatprep.mubr.bf16.mxu0 %v1208_v47 }
  0x52   : > { %800 = vmatmul.mubr.bf16.gmra.mrb[20].mxu1 %v1219_v59 }
  0x53   : > { %807 = vmatprep.mubr.bf16.mxu1 %v1220_v60 }
  0x57   : > { %667 = vmatmul.mubr.bf16.gmra.mrb[8].mxu0 %v1210_v52 }
  0x58   : > { %676 = vmatprep.mubr.bf16.mxu0 %v1211_v53 }
  0x5a   : > { %808 = vmatmul.mubr.bf16.gmra.mrb[24].mxu1 %v1222_v61 }
  0x5b   : > { %815 = vmatprep.mubr.bf16.mxu1 %v1223_v62 }
  0x5f   : > { %677 = vmatmul.mubr.bf16.gmra.mrb[12].mxu0 %v1213_v55 }
  0x60   : > { %686 = vmatprep.mubr.bf16.mxu0 %v1214_v56 }
  0x62   : > { %816 = vmatmul.mubr.bf16.gmra.mrb[28].mxu1 %v1225_v63 }
  0x67   : > { %687 = vmatmul.mubr.bf16.gmra.mrb[16].mxu0 %v1216_v57 }
  0x68   : > { %696 = vmatprep.mubr.bf16.mxu0 %v1217_v58 }
  0x6f   : > { %697 = vmatmul.mubr.bf16.gmra.mrb[20].mxu0 %v1219_v59 }
  0x70   : > { %706 = vmatprep.mubr.bf16.mxu0 %v1220_v60 }
  0x77   : > { %707 = vmatmul.mubr.bf16.gmra.mrb[24].mxu0 %v1222_v61 }
  0x78   : > { %716 = vmatprep.mubr.bf16.mxu0 %v1223_v62 }
  0x7f   : > { %717 = vmatmul.mubr.bf16.gmra.mrb[28].mxu0 %v1225_v63 }
  0xfd   : > { %v1065_v0 = vpop.f32.mrb[0].mxu1 }
  0xfe   : > { %v1066_v1 = vpop.f32.mrb[1].mxu1 }
  0xff   : > { %v1067_v2 = vadd.f32 %v1066_v1, %v1065_v0  ;;  %v1068_v3 = vpop.f32.mrb[2].mxu1 }
 0x100   : > { %v1069_v4 = vpop.f32.mrb[3].mxu1 }
 0x101   : > { %826 = vst [vmem:[%s1458_s21 + $0x10] sm:$0xff] %v1067_v2  ;;  %v1070_v5 = vadd.f32 %v1069_v4, %v1068_v3 }
 0x103   : > { %829 = vst [vmem:[%s1458_s21 + $0x28] sm:$0xff] %v1070_v5 }
 0x105   : > { %v1071_v6 = vpop.f32.mrb[4].mxu1 }
 0x106   : > { %v1072_v7 = vpop.f32.mrb[5].mxu1 }
 0x107   : > { %v1073_v8 = vadd.f32 %v1072_v7, %v1071_v6  ;;  %v1074_v9 = vpop.f32.mrb[6].mxu1 }
 0x108   : > { %v1075_v10 = vpop.f32.mrb[7].mxu1 }
 0x109   : > { %832 = vst [vmem:[%s1458_s21 + $0x40] sm:$0xff] %v1073_v8  ;;  %v1076_v11 = vadd.f32 %v1075_v10, %v1074_v9 }
 0x10b   : > { %835 = vst [vmem:[%s1458_s21 + $0x58] sm:$0xff] %v1076_v11 }
 0x10d   : > { %v1077_v12 = vpop.f32.mrb[8].mxu1 }
 0x10e   : > { %v1078_v13 = vpop.f32.mrb[9].mxu1 }
 0x10f   : > { %v1079_v14 = vadd.f32 %v1078_v13, %v1077_v12  ;;  %v1080_v15 = vpop.f32.mrb[10].mxu1 }
 0x110   : > { %v1081_v16 = vpop.f32.mrb[11].mxu1 }
 0x111   : > { %838 = vst [vmem:[%s1458_s21 + $0x70] sm:$0xff] %v1079_v14  ;;  %v1082_v17 = vadd.f32 %v1081_v16, %v1080_v15 }
 0x113   : > { %841 = vst [vmem:[%s1458_s21 + $0x88] sm:$0xff] %v1082_v17 }
 0x115   : > { %v1083_v22 = vpop.f32.mrb[12].mxu1 }
 0x116   : > { %v1084_v23 = vpop.f32.mrb[13].mxu1 }
 0x117   : > { %v1085_v24 = vadd.f32 %v1084_v23, %v1083_v22  ;;  %v1086_v25 = vpop.f32.mrb[14].mxu1 }
 0x118   : > { %v1087_v26 = vpop.f32.mrb[15].mxu1 }
 0x119   : > { %844 = vst [vmem:[%s1458_s21 + $0xa0] sm:$0xff] %v1085_v24  ;;  %v1088_v27 = vadd.f32 %v1087_v26, %v1086_v25 }
 0x11a   : > { %v648_v18 = vpop.f32.mrb[0].mxu0 }
 0x11b   : > { %824 = vst [vmem:[%s1458_s21] sm:$0xff] %v648_v18  ;;  %v650_v19 = vpop.f32.mrb[1].mxu0  ;;  %847 = vst [vmem:[%s1458_s21 + $0xb8] sm:$0xff] %v1088_v27 }
 0x11c   : > { %825 = vst [vmem:[%s1458_s21 + $0x8] sm:$0xff] %v650_v19  ;;  %v652_v20 = vpop.f32.mrb[2].mxu0 }
 0x11d   : > { %827 = vst [vmem:[%s1458_s21 + $0x18] sm:$0xff] %v652_v20  ;;  %v654_v21 = vpop.f32.mrb[3].mxu0  ;;  %v1089_v32 = vpop.f32.mrb[16].mxu1 }
 0x11e   : > { %828 = vst [vmem:[%s1458_s21 + $0x20] sm:$0xff] %v654_v21  ;;  %v1090_v33 = vpop.f32.mrb[17].mxu1 }
 0x11f   : > { %v1091_v34 = vadd.f32 %v1090_v33, %v1089_v32  ;;  %v1092_v35 = vpop.f32.mrb[18].mxu1 }
 0x120   : > { %v1093_v36 = vpop.f32.mrb[19].mxu1 }
 0x121   : > { %850 = vst [vmem:[%s1458_s21 + $0xd0] sm:$0xff] %v1091_v34  ;;  %v1094_v37 = vadd.f32 %v1093_v36, %v1092_v35 }
 0x122   : > { %v658_v28 = vpop.f32.mrb[4].mxu0 }
 0x123   : > { %830 = vst [vmem:[%s1458_s21 + $0x30] sm:$0xff] %v658_v28  ;;  %v660_v29 = vpop.f32.mrb[5].mxu0  ;;  %853 = vst [vmem:[%s1458_s21 + $0xe8] sm:$0xff] %v1094_v37 }
 0x124   : > { %831 = vst [vmem:[%s1458_s21 + $0x38] sm:$0xff] %v660_v29  ;;  %v662_v30 = vpop.f32.mrb[6].mxu0 }
 0x125   : > { %833 = vst [vmem:[%s1458_s21 + $0x48] sm:$0xff] %v662_v30  ;;  %v664_v31 = vpop.f32.mrb[7].mxu0  ;;  %v1095_v42 = vpop.f32.mrb[20].mxu1 }
 0x126   : > { %834 = vst [vmem:[%s1458_s21 + $0x50] sm:$0xff] %v664_v31  ;;  %v1096_v43 = vpop.f32.mrb[21].mxu1 }
 0x127   : > { %v1097_v44 = vadd.f32 %v1096_v43, %v1095_v42  ;;  %v1098_v45 = vpop.f32.mrb[22].mxu1 }
 0x128   : > { %v1099_v46 = vpop.f32.mrb[23].mxu1 }
 0x129   : > { %856 = vst [vmem:[%s1458_s21 + $0x100] sm:$0xff] %v1097_v44  ;;  %v1100_v47 = vadd.f32 %v1099_v46, %v1098_v45 }
 0x12a   : > { %v668_v38 = vpop.f32.mrb[8].mxu0 }
 0x12b   : > { %836 = vst [vmem:[%s1458_s21 + $0x60] sm:$0xff] %v668_v38  ;;  %v670_v39 = vpop.f32.mrb[9].mxu0  ;;  %859 = vst [vmem:[%s1458_s21 + $0x118] sm:$0xff] %v1100_v47 }
 0x12c   : > { %837 = vst [vmem:[%s1458_s21 + $0x68] sm:$0xff] %v670_v39  ;;  %v672_v40 = vpop.f32.mrb[10].mxu0 }
 0x12d   : > { %839 = vst [vmem:[%s1458_s21 + $0x78] sm:$0xff] %v672_v40  ;;  %v674_v41 = vpop.f32.mrb[11].mxu0  ;;  %v1101_v52 = vpop.f32.mrb[24].mxu1 }
 0x12e   : > { %840 = vst [vmem:[%s1458_s21 + $0x80] sm:$0xff] %v674_v41  ;;  %v1102_v53 = vpop.f32.mrb[25].mxu1 }
 0x12f   : > { %v1103_v54 = vadd.f32 %v1102_v53, %v1101_v52  ;;  %v1104_v55 = vpop.f32.mrb[26].mxu1 }
 0x130   : > { %v1105_v56 = vpop.f32.mrb[27].mxu1 }
 0x131   : > { %862 = vst [vmem:[%s1458_s21 + $0x130] sm:$0xff] %v1103_v54  ;;  %v1106_v57 = vadd.f32 %v1105_v56, %v1104_v55 }
 0x132   : > { %v678_v48 = vpop.f32.mrb[12].mxu0 }
 0x133   : > { %842 = vst [vmem:[%s1458_s21 + $0x90] sm:$0xff] %v678_v48  ;;  %v680_v49 = vpop.f32.mrb[13].mxu0  ;;  %865 = vst [vmem:[%s1458_s21 + $0x148] sm:$0xff] %v1106_v57 }
 0x134   : > { %843 = vst [vmem:[%s1458_s21 + $0x98] sm:$0xff] %v680_v49  ;;  %v682_v50 = vpop.f32.mrb[14].mxu0 }
 0x135   : > { %845 = vst [vmem:[%s1458_s21 + $0xa8] sm:$0xff] %v682_v50  ;;  %v684_v51 = vpop.f32.mrb[15].mxu0  ;;  %v1107_v62 = vpop.f32.mrb[28].mxu1 }
 0x136   : > { %846 = vst [vmem:[%s1458_s21 + $0xb0] sm:$0xff] %v684_v51  ;;  %v1108_v63 = vpop.f32.mrb[29].mxu1 }
 0x137   : > { %v1109_v0 = vadd.f32 %v1108_v63, %v1107_v62  ;;  %v1110_v1 = vpop.f32.mrb[30].mxu1 }
 0x138   : > { %v1111_v2 = vpop.f32.mrb[31].mxu1 }
 0x139   : > { %868 = vst [vmem:[%s1458_s21 + $0x160] sm:$0xff] %v1109_v0  ;;  %v1112_v3 = vadd.f32 %v1111_v2, %v1110_v1 }
 0x13a   : > { %v688_v58 = vpop.f32.mrb[16].mxu0 }
 0x13b   : > { %848 = vst [vmem:[%s1458_s21 + $0xc0] sm:$0xff] %v688_v58  ;;  %v690_v59 = vpop.f32.mrb[17].mxu0  ;;  %871 = vst [vmem:[%s1458_s21 + $0x178] sm:$0xff] %v1112_v3 }
 0x13c   : > { %849 = vst [vmem:[%s1458_s21 + $0xc8] sm:$0xff] %v690_v59  ;;  %v692_v60 = vpop.f32.mrb[18].mxu0 }
 0x13d   : > { %851 = vst [vmem:[%s1458_s21 + $0xd8] sm:$0xff] %v692_v60  ;;  %v694_v61 = vpop.f32.mrb[19].mxu0 }
 0x13e   : > { %852 = vst [vmem:[%s1458_s21 + $0xe0] sm:$0xff] %v694_v61 }
 0x142   : > { %v698_v4 = vpop.f32.mrb[20].mxu0 }
 0x143   : > { %854 = vst [vmem:[%s1458_s21 + $0xf0] sm:$0xff] %v698_v4  ;;  %v700_v5 = vpop.f32.mrb[21].mxu0 }
 0x144   : > { %855 = vst [vmem:[%s1458_s21 + $0xf8] sm:$0xff] %v700_v5  ;;  %v702_v6 = vpop.f32.mrb[22].mxu0 }
 0x145   : > { %857 = vst [vmem:[%s1458_s21 + $0x108] sm:$0xff] %v702_v6  ;;  %v704_v7 = vpop.f32.mrb[23].mxu0 }
 0x146   : > { %858 = vst [vmem:[%s1458_s21 + $0x110] sm:$0xff] %v704_v7 }
 0x14a   : > { %v708_v8 = vpop.f32.mrb[24].mxu0 }
 0x14b   : > { %860 = vst [vmem:[%s1458_s21 + $0x120] sm:$0xff] %v708_v8  ;;  %v710_v9 = vpop.f32.mrb[25].mxu0 }
 0x14c   : > { %861 = vst [vmem:[%s1458_s21 + $0x128] sm:$0xff] %v710_v9  ;;  %v712_v10 = vpop.f32.mrb[26].mxu0 }
 0x14d   : > { %863 = vst [vmem:[%s1458_s21 + $0x138] sm:$0xff] %v712_v10  ;;  %v714_v11 = vpop.f32.mrb[27].mxu0 }
 0x14e   : > { %864 = vst [vmem:[%s1458_s21 + $0x140] sm:$0xff] %v714_v11 }
 0x152   : > { %v718_v12 = vpop.f32.mrb[28].mxu0 }
 0x153   : > { %866 = vst [vmem:[%s1458_s21 + $0x150] sm:$0xff] %v718_v12  ;;  %v720_v13 = vpop.f32.mrb[29].mxu0 }
 0x154   : > { %867 = vst [vmem:[%s1458_s21 + $0x158] sm:$0xff] %v720_v13  ;;  %v722_v14 = vpop.f32.mrb[30].mxu0 }
 0x155   : > { %869 = vst [vmem:[%s1458_s21 + $0x168] sm:$0xff] %v722_v14  ;;  %v724_v15 = vpop.f32.mrb[31].mxu0 }
 0x156   : > { %870 = vst [vmem:[%s1458_s21 + $0x170] sm:$0xff] %v724_v15 }
 0x157 PF: > { %s12_s11 = sadd.s32 1, %s1248_s11   ;;  %s1520_s9 = smov %s1244_s10 }
 0x158   : > { %p9_p5 = scmp.ge.s32.totalorder %s12_s11, 5   ;;  %s1521_s10 = smov %s1523_s12 }
 0x15a   :  { %11 = sbr.rel (!%p9_p5) target bundleno = 2 (0x2), region = 61 }

</bundles_post_ra>
